<compile_context>
chip_gen: v6e
topology: v6e:2x2x1
jax: 0.10.0
libtpu: 0.0.40
codegen_flags: <defaults>
</compile_context>

<pallas_src>
import math

import jax
import jax.numpy as jnp
from jax.experimental import pallas as pl
from jax.experimental.pallas import tpu as pltpu


def recommender_mlp_kernel(x_ref, w1_ref, w2_ref, b2_ref, o_ref):
    # Linear-1 (BatchNorm eval-mode folded into the weights; bias carried via
    # the ones-row of x / bias column of w1):
    #   (hid, K_pad) @ (K_pad, tb) -> (hid, tb), f32 accumulation on the MXU.
    h = jnp.dot(w1_ref[...], x_ref[...], preferred_element_type=jnp.float32)

    # ReLU.  Dropout(0.3) is identity in eval mode.
    # TODO(synk): training-mode dropout (random mask) not implemented.
    h = jnp.maximum(h, 0.0)

    # Linear-2 with out_features=1: VPU multiply + sublane reduce (lane-dense
    # y of shape (1, tb)); b2 read from SMEM.
    y = jnp.sum(h * w2_ref[...], axis=0, keepdims=True) + b2_ref[0]

    # Rating rescale: 1 + 4 * sigmoid(y)   (EUP slot is otherwise idle).
    o_ref[...] = 1.0 + 4.0 * jax.nn.sigmoid(y)


def deep_recommender_forward(user_ids, business_ids, user_feats, business_feats,
                             params, *, tile_b=8192, compute_dtype=jnp.bfloat16):
    """Glue: embedding gather + BN/bias fold + stream packing in JAX,
    lane-dense tiled MLP in Pallas."""
    u_emb = params["user_embedding"][user_ids].astype(jnp.float32)          # (B, E)
    b_emb = params["business_embedding"][business_ids].astype(jnp.float32)  # (B, E)
    user_feats = user_feats.astype(jnp.float32)                             # (B, Fu)
    business_feats = business_feats.astype(jnp.float32)                     # (B, Fb)

    B = u_emb.shape[0]
    emb_dim = u_emb.shape[1]
    uf_dim = user_feats.shape[1]
    bf_dim = business_feats.shape[1]
    in_dim = 2 * emb_dim + uf_dim + bf_dim
    hid = params["w1"].shape[1]  # 32

    # ---- Fold BatchNorm1d (eval mode) into Linear-1 (exact affine fold). ----
    eps = 1e-5
    scale = params["bn_gamma"] * jax.lax.rsqrt(params["bn_var"] + eps)       # (1, hid)
    w1 = params["w1"] * scale                                                # (in_dim, hid)
    b1 = (params["b1"] - params["bn_mean"]) * scale + params["bn_beta"]      # (1, hid)

    # ---- Augmented, transposed, lane-padded Linear-1 weight:
    #      columns [0:in_dim] = w1^T, column in_dim = folded bias, rest 0. ----
    K = in_dim + 1
    K_pad = ((K + 127) // 128) * 128
    w1_aug = jnp.zeros((hid, K_pad), jnp.float32)
    w1_aug = w1_aug.at[:, :in_dim].set(w1.T)
    w1_aug = w1_aug.at[:, in_dim].set(b1[0])
    w1_aug = w1_aug.astype(compute_dtype)                                    # (hid, K_pad)

    w2_col = params["w2"].reshape(hid, 1).astype(jnp.float32)                # (hid, 1)
    b2 = params["b2"].reshape(1).astype(jnp.float32)                         # (1,) -> SMEM

    # ---- Batch tiling: batch on the lane axis, tiles multiple of 128. ----
    tb = max(128, (int(tile_b) // 128) * 128)
    tb = min(tb, ((B + 127) // 128) * 128)
    b_pad = ((B + tb - 1) // tb) * tb
    n_tiles = b_pad // tb

    # ---- Pack the 4 streams (+ ones row for the bias, + K-zero pad) into one
    #      (K_pad, B) slab; XLA fuses gather/transpose/concat/cast into a
    #      single materialization.  Only the batch tail is padded. ----
    parts = [u_emb.T, b_emb.T, user_feats.T, business_feats.T,
             jnp.ones((1, B), jnp.float32)]
    if K_pad > K:
        parts.append(jnp.zeros((K_pad - K, B), jnp.float32))
    x_t = jnp.concatenate(parts, axis=0).astype(compute_dtype)               # (K_pad, B)
    if b_pad != B:
        x_t = jnp.pad(x_t, ((0, 0), (0, b_pad - B)))

    itemsize = jnp.dtype(compute_dtype).itemsize

    out = pl.pallas_call(
        recommender_mlp_kernel,
        out_shape=jax.ShapeDtypeStruct((1, b_pad), jnp.float32),
        grid=(n_tiles,),
        in_specs=[
            pl.BlockSpec((K_pad, tb), lambda i: (0, i)),         # packed x^T
            pl.BlockSpec((hid, K_pad), lambda i: (0, 0)),        # w1^T (BN+bias folded), resident
            pl.BlockSpec((hid, 1), lambda i: (0, 0)),            # w2 column, resident
            pl.BlockSpec(memory_space=pltpu.MemorySpace.SMEM),   # b2 scalar
        ],
        out_specs=pl.BlockSpec((1, tb), lambda i: (0, i)),       # lane-dense output
        compiler_params=pltpu.CompilerParams(
            dimension_semantics=("parallel",),
            vmem_limit_bytes=32 * 1024 * 1024,
        ),
        cost_estimate=pl.CostEstimate(
            flops=2 * b_pad * K_pad * hid + 3 * b_pad * hid + 4 * b_pad,
            transcendentals=b_pad,
            bytes_accessed=(K_pad * b_pad * itemsize        # x slab read
                            + hid * K_pad * itemsize        # w1
                            + hid * 4 + 4                   # w2, b2
                            + b_pad * 4),                   # output write
        ),
    )(x_t, w1_aug, w2_col, b2)

    return out[0, :B].reshape(B, 1)


def xavier_uniform(key, fan_in, fan_out):
    # Matches nn.init.xavier_uniform_ for a (fan_out, fan_in) PyTorch weight;
    # we store it transposed as (fan_in, fan_out).
    limit = math.sqrt(6.0 / (fan_in + fan_out))
    return jax.random.uniform(key, (fan_in, fan_out), jnp.float32, -limit, limit)


def init_params(key, num_users, num_businesses, user_feat_dim, biz_feat_dim, emb_dim=32):
    k_ue, k_be, k_w1, k_w2 = jax.random.split(key, 4)
    in_dim = emb_dim * 2 + user_feat_dim + biz_feat_dim
    params = {
        # nn.Embedding default init: N(0, 1)
        "user_embedding": jax.random.normal(k_ue, (num_users, emb_dim), jnp.float32),
        "business_embedding": jax.random.normal(k_be, (num_businesses, emb_dim), jnp.float32),
        # Linear layers: xavier_uniform weight, zero bias (per _init_weights)
        "w1": xavier_uniform(k_w1, in_dim, 32),
        "b1": jnp.zeros((1, 32), jnp.float32),
        "w2": xavier_uniform(k_w2, 32, 1),
        "b2": jnp.zeros((1, 1), jnp.float32),
        # BatchNorm1d defaults: gamma=1, beta=0, running_mean=0, running_var=1
        "bn_gamma": jnp.ones((1, 32), jnp.float32),
        "bn_beta": jnp.zeros((1, 32), jnp.float32),
        "bn_mean": jnp.zeros((1, 32), jnp.float32),
        "bn_var": jnp.ones((1, 32), jnp.float32),
    }
    return params


def _reference_forward(user_ids, business_ids, user_feats, business_feats, params):
    """Pure-JAX reference of the PyTorch forward (eval mode)."""
    u = params["user_embedding"][user_ids]
    b = params["business_embedding"][business_ids]
    x = jnp.concatenate([u, b, user_feats, business_feats], axis=1).astype(jnp.float32)
    h = x @ params["w1"] + params["b1"]
    h = (h - params["bn_mean"]) * jax.lax.rsqrt(params["bn_var"] + 1e-5)
    h = h * params["bn_gamma"] + params["bn_beta"]
    h = jnp.maximum(h, 0.0)
    y = h @ params["w2"] + params["b2"]
    return 1.0 + 4.0 * jax.nn.sigmoid(y)


if __name__ == "__main__":
    num_users = 16
    num_businesses = 24
    user_feat_dim = 8
    biz_feat_dim = 8
    emb_dim = 32
    batch = 8

    key = jax.random.PRNGKey(0)
    k_params, k_uid, k_bid, k_uf, k_bf = jax.random.split(key, 5)

    params = init_params(k_params, num_users, num_businesses,
                         user_feat_dim, biz_feat_dim, emb_dim)

    user_ids = jax.random.randint(k_uid, (batch,), 0, num_users)
    business_ids = jax.random.randint(k_bid, (batch,), 0, num_businesses)
    user_feats = jax.random.normal(k_uf, (batch, user_feat_dim), jnp.float32)
    business_feats = jax.random.normal(k_bf, (batch, biz_feat_dim), jnp.float32)

    ref = _reference_forward(user_ids, business_ids, user_feats, business_feats, params)

    # f32 path: bit-tight check of the kernel structure (fold, pack, layouts).
    out_f32 = deep_recommender_forward(user_ids, business_ids, user_feats,
                                       business_feats, params,
                                       compute_dtype=jnp.float32)
    out_f32 = jax.block_until_ready(out_f32)
    assert out_f32.shape == (batch, 1)
    assert bool(jnp.allclose(out_f32, ref, atol=1e-5, rtol=1e-5))

    # bf16 path (default / perf config): looser tolerance for the narrowed inputs.
    out = deep_recommender_forward(user_ids, business_ids, user_feats,
                                   business_feats, params)
    out = jax.block_until_ready(out)
    assert out.shape == (batch, 1)
    assert bool(jnp.all(out >= 1.0)) and bool(jnp.all(out <= 5.0))
    assert bool(jnp.allclose(out, ref, atol=5e-2, rtol=5e-2))

    print("KERNEL_OK")
</pallas_src>

<mosaic_0001>
module attributes {stable_mosaic.version = 11 : i64} {
  func.func @recommender_mlp_kernel(%arg0: i32, %arg1: memref<128x128xf32, #tpu.memory_space<vmem>>, %arg2: memref<32x128xf32, #tpu.memory_space<vmem>>, %arg3: memref<32x1xf32, #tpu.memory_space<vmem>>, %arg4: memref<1xf32, #tpu.memory_space<smem>>, %arg5: memref<1x128xf32, #tpu.memory_space<vmem>>) attributes {dimension_semantics = [#tpu.dimension_semantics<parallel>], iteration_bounds = array<i64: 1>, scalar_prefetch = 0 : i64, scratch_operands = 0 : i64, tpu.core_type = #tpu.core_type<tc>, window_params = [{transform_indices = @transform_0, window_bounds = array<i64: 128, 128>}, {pipeline_mode = #tpu.pipeline_mode<synchronous>, transform_indices = @transform_1, window_bounds = array<i64: 32, 128>}, {pipeline_mode = #tpu.pipeline_mode<synchronous>, transform_indices = @transform_2, window_bounds = array<i64: 32, 1>}, {transform_indices = @transform_3, window_bounds = array<i64: 1>}, {transform_indices = @transform_4, window_bounds = array<i64: 1, 128>}]} {
    %c0 = arith.constant 0 : index
    %c0_0 = arith.constant 0 : index
    %0 = vector.load %arg2[%c0, %c0_0] : memref<32x128xf32, #tpu.memory_space<vmem>>, vector<32x128xf32>
    %c0_1 = arith.constant 0 : index
    %c0_2 = arith.constant 0 : index
    %1 = vector.load %arg1[%c0_1, %c0_2] : memref<128x128xf32, #tpu.memory_space<vmem>>, vector<128x128xf32>
    %cst = arith.constant dense<0.000000e+00> : vector<32x128xf32>
    %2 = tpu.matmul %0, %1, %cst {dimension_numbers = #tpu.dot_dimension_numbers<[1], [0], [0], [1], [0, 0, 1, 1], [], []>} : vector<32x128xf32>, vector<128x128xf32>, vector<32x128xf32> -> vector<32x128xf32>
    %cst_3 = arith.constant 0.000000e+00 : f32
    %3 = vector.broadcast %cst_3 : f32 to vector<32x128xf32>
    %4 = arith.maximumf %2, %3 : vector<32x128xf32>
    %c0_4 = arith.constant 0 : index
    %c0_5 = arith.constant 0 : index
    %5 = vector.load %arg3[%c0_4, %c0_5] : memref<32x1xf32, #tpu.memory_space<vmem>>, vector<32x1xf32>
    %6 = vector.broadcast %5 : vector<32x1xf32> to vector<32x128xf32>
    %7 = arith.mulf %4, %6 : vector<32x128xf32>
    %cst_6 = arith.constant dense<0.000000e+00> : vector<128xf32>
    %8 = vector.multi_reduction <add>, %7, %cst_6 [0] : vector<32x128xf32> to vector<128xf32>
    %9 = vector.shape_cast %8 : vector<128xf32> to vector<1x128xf32>
    %c0_7 = arith.constant 0 : index
    %10 = memref.load %arg4[%c0_7] : memref<1xf32, #tpu.memory_space<smem>>
    %11 = vector.broadcast %10 : f32 to vector<1x128xf32>
    %12 = arith.addf %9, %11 : vector<1x128xf32>
    %13 = arith.negf %12 : vector<1x128xf32>
    %14 = math.exp %13 : vector<1x128xf32>
    %cst_8 = arith.constant 1.000000e+00 : f32
    %15 = vector.broadcast %cst_8 : f32 to vector<1x128xf32>
    %16 = arith.addf %15, %14 : vector<1x128xf32>
    %17 = arith.divf %15, %16 : vector<1x128xf32>
    %cst_9 = arith.constant 4.000000e+00 : f32
    %18 = vector.broadcast %cst_9 : f32 to vector<1x128xf32>
    %19 = arith.mulf %18, %17 : vector<1x128xf32>
    %cst_10 = arith.constant 1.000000e+00 : f32
    %20 = vector.broadcast %cst_10 : f32 to vector<1x128xf32>
    %21 = arith.addf %20, %19 : vector<1x128xf32>
    %c0_11 = arith.constant 0 : index
    %c0_12 = arith.constant 0 : index
    %22 = vector.load %arg5[%c0_11, %c0_12] : memref<1x128xf32, #tpu.memory_space<vmem>>, vector<1x128xf32>
    tpu.vector_store %arg5[%c0_11, %c0_12], %21 {strides = array<i32>} : memref<1x128xf32, #tpu.memory_space<vmem>>, vector<1x128xf32>,
    return
  }
  func.func @transform_0(%arg0: i32) -> (i32, i32) {
    %c0_i32 = arith.constant 0 : i32
    %c0_i32_0 = arith.constant 0 : i32
    return %c0_i32, %arg0 : i32, i32
  }
  func.func @transform_1(%arg0: i32) -> (i32, i32) {
    %c0_i32 = arith.constant 0 : i32
    %c0_i32_0 = arith.constant 0 : i32
    %c0_i32_1 = arith.constant 0 : i32
    return %c0_i32, %c0_i32_0 : i32, i32
  }
  func.func @transform_2(%arg0: i32) -> (i32, i32) {
    %c0_i32 = arith.constant 0 : i32
    %c0_i32_0 = arith.constant 0 : i32
    %c0_i32_1 = arith.constant 0 : i32
    return %c0_i32, %c0_i32_0 : i32, i32
  }
  func.func @transform_3(%arg0: i32) -> i32 {
    %c0_i32 = arith.constant 0 : i32
    %c0_i32_0 = arith.constant 0 : i32
    return %c0_i32 : i32
  }
  func.func @transform_4(%arg0: i32) -> (i32, i32) {
    %c0_i32 = arith.constant 0 : i32
    %c0_i32_0 = arith.constant 0 : i32
    return %c0_i32, %arg0 : i32, i32
  }
}

</mosaic_0001>

<bundles_post_ra>
// kernel: tpu_custom_call.1
= control target key start
LH: loop header
LB: loop body
LE: loop exit
PB: predicated region body
PF: predicated region fallthrough
CT: control target
= control target key end

     0   :  { %10 = vsyncpa [#allocation4], 0  ;;  %s415_s0 = inlined_call_operand.hbm [shape: f32[128,128], index: 0, kind: input, shape index: {}]   ;;  %s416_s1 = inlined_call_operand.vmem [shape: f32[32,128], index: 1, kind: input, shape index: {}]   ;;  %s417_s2 = inlined_call_operand.vmem [shape: f32[32,1], index: 2, kind: input, shape index: {}]   ;;  %s418_s3 = inlined_call_operand.<no memory space> [shape: f32[1], index: 3, kind: input, shape index: {}]   ;;  %s419_s4 = inlined_call_operand.hbm [shape: f32[1,128], index: 4, kind: output, shape index: {}]  }
   0x1   :  { %11 = vsyncpa [#allocation5], 0  ;;  %s352_s15 = smov [#allocation3]  }
   0x2   :  { %s17_s16 = sshll.u32 %s352_s15, 4  ;;  %s18_s16 = int_to_ptr.vmem [resolvable:$true] %s17_s16 }
   0x3   :  { %s316_s17 = scalar_lea.vmem %s18_s16, 2048  ;;  %p321_p1 = scmp.lt.s32.totalorder %s18_s16, %s18_s16 }
   0x4   :  { %p317_p0 = scmp.ne.s32.totalorder %s18_s16, %s316_s17  ;;  %p322_p2 = scmp.lt.s32.totalorder %s316_s17, %s316_s17 }
   0x6   :  { %p323_p3 = por %p322_p2, %p321_p1 }
   0x8   :  { %p324_p4 = pnand %p323_p3, %p317_p0 }
   0xa   :  { %327 = shalt.err (!%p324_p4)
}
   0xb   :  { %s353_s18 = smov 128   ;;  %s354_s19 = smov 8  }
   0xc   :  { %23 = dma.hbm_to_vmem [thread:$0]  %s415_s0, 2048, %s18_s16, [#allocation4], %s353_s18, %s353_s18, %s354_s19  }
   0xd   :  { %348 = dma.done.wait [#allocation4], 2048  }
   0xe   :  { %349 = vsyncadd [#allocation4], 4294965248  ;;  %v355_v0 = vmov 0   ;;  %v52_v1 = vld [vmem:[#allocation3 + $0x78] sm:$0xff]  ;;  %v51_v2 = vld [vmem:[#allocation3 + $0x70] sm:$0xff]  ;;  %v180_v49 = vstv %s418_s3  ;;  %s356_s11 = smov [#allocation6]  }
   0xf   :  { %302 = vset.pattern.permute.xlu0 %v355_v0  ;;  %303 = vset.pattern.permute.xlu1 %v355_v0  ;;  %v50_v3 = vld [vmem:[#allocation3 + $0x68] sm:$0xff]  ;;  %v49_v4 = vld [vmem:[#allocation3 + $0x60] sm:$0xff]  ;;  %v48_v5 = vld [vmem:[#allocation3 + $0x58] sm:$0xff]  ;;  %s197_s12 = sshll.u32 %s356_s11, 4  ;;  %s198_s12 = int_to_ptr.vmem [resolvable:$true] %s197_s12 }
  0x10   :  { %227 = vmatprep.subr.mxu0 %v52_v1  ;;  %265 = vmatprep.subr.mxu1 %v52_v1  ;;  %v47_v6 = vld [vmem:[#allocation3 + $0x50] sm:$0xff]  ;;  %v46_v7 = vld [vmem:[#allocation3 + $0x48] sm:$0xff]  ;;  %v45_v8 = vld [vmem:[#allocation3 + $0x40] sm:$0xff]  ;;  %s328_s13 = scalar_lea.vmem %s198_s12, 16  ;;  %s332_s14 = scalar_lea.vmem %s198_s12, 32 }
  0x11   :  { %228 = vmatpush3.msra.mxu0 %v52_v1  ;;  %281 = vmatpush3.msra.mxu1 %v52_v1  ;;  %v44_v9 = vld [vmem:[#allocation3 + $0x38] sm:$0xff]  ;;  %v43_v10 = vld [vmem:[#allocation3 + $0x30] sm:$0xff]  ;;  %v42_v11 = vld [vmem:[#allocation3 + $0x28] sm:$0xff]  ;;  %p329_p5 = scmp.ne.s32.totalorder %s198_s12, %s328_s13  ;;  %p333_p6 = scmp.lt.s32.totalorder %s198_s12, %s198_s12 }
  0x12   :  { %229 = vmatprep.subr.mxu0 %v51_v2  ;;  %266 = vmatprep.subr.mxu1 %v51_v2  ;;  %v41_v12 = vld [vmem:[#allocation3 + $0x20] sm:$0xff]  ;;  %v40_v13 = vld [vmem:[#allocation3 + $0x18] sm:$0xff]  ;;  %v39_v14 = vld [vmem:[#allocation3 + $0x10] sm:$0xff]  ;;  %p334_p7 = scmp.lt.s32.totalorder %s332_s14, %s328_s13 }
  0x13   :  { %230 = vmatpush3.msra.mxu0 %v51_v2  ;;  %282 = vmatpush3.msra.mxu1 %v51_v2  ;;  %v38_v15 = vld [vmem:[#allocation3 + $0x8] sm:$0xff]  ;;  %v37_v16 = vld [vmem:[#allocation3] sm:$0xff]  ;;  %v35_v18 = vld [vmem:[%s416_s1 + $0x10] sm:$0xff] }
  0x14   :  { %231 = vmatprep.subr.mxu0 %v50_v3  ;;  %267 = vmatprep.subr.mxu1 %v50_v3  ;;  %v33_v17 = vld [vmem:[%s416_s1] sm:$0xff]  ;;  %v34_v19 = vld [vmem:[%s416_s1 + $0x8] sm:$0xff]  ;;  %v36_v20 = vld [vmem:[%s416_s1 + $0x18] sm:$0xff]  ;;  %p335_p8 = por %p334_p7, %p333_p6 }
  0x15   :  { %232 = vmatpush3.msra.mxu0 %v50_v3  ;;  %283 = vmatpush3.msra.mxu1 %v50_v3  ;;  %v142_v21 = vld [vmem:[%s417_s2] sm:$0xff]  ;;  %v144_v22 = vld [vmem:[%s417_s2 + $0x10] sm:$0xff]  ;;  %v143_v23 = vld [vmem:[%s417_s2 + $0x8] sm:$0xff] }
  0x16   :  { %233 = vmatprep.subr.mxu0 %v49_v4  ;;  %268 = vmatprep.subr.mxu1 %v49_v4  ;;  %v145_v24 = vld [vmem:[%s417_s2 + $0x18] sm:$0xff]  ;;  %p336_p9 = pnand %p335_p8, %p329_p5 }
  0x17   :  { %234 = vmatpush3.msra.mxu0 %v49_v4  ;;  %284 = vmatpush3.msra.mxu1 %v49_v4 }
  0x18   :  { %235 = vmatprep.subr.mxu0 %v48_v5  ;;  %269 = vmatprep.subr.mxu1 %v48_v5 }
  0x19   :  { %236 = vmatpush3.msra.mxu0 %v48_v5  ;;  %285 = vmatpush3.msra.mxu1 %v48_v5 }
  0x1a   :  { %237 = vmatprep.subr.mxu0 %v47_v6  ;;  %270 = vmatprep.subr.mxu1 %v47_v6 }
  0x1b   :  { %238 = vmatpush3.msra.mxu0 %v47_v6  ;;  %286 = vmatpush3.msra.mxu1 %v47_v6 }
  0x1c   :  { %239 = vmatprep.subr.mxu0 %v46_v7  ;;  %271 = vmatprep.subr.mxu1 %v46_v7 }
  0x1d   :  { %240 = vmatpush3.msra.mxu0 %v46_v7  ;;  %287 = vmatpush3.msra.mxu1 %v46_v7 }
  0x1e   :  { %241 = vmatprep.subr.mxu0 %v45_v8  ;;  %272 = vmatprep.subr.mxu1 %v45_v8 }
  0x1f   :  { %242 = vmatpush3.msra.mxu0 %v45_v8  ;;  %288 = vmatpush3.msra.mxu1 %v45_v8 }
  0x20   :  { %243 = vmatprep.subr.mxu0 %v44_v9  ;;  %273 = vmatprep.subr.mxu1 %v44_v9 }
  0x21   :  { %244 = vmatpush3.msra.mxu0 %v44_v9  ;;  %289 = vmatpush3.msra.mxu1 %v44_v9 }
  0x22   :  { %245 = vmatprep.subr.mxu0 %v43_v10  ;;  %274 = vmatprep.subr.mxu1 %v43_v10 }
  0x23   :  { %246 = vmatpush3.msra.mxu0 %v43_v10  ;;  %290 = vmatpush3.msra.mxu1 %v43_v10 }
  0x24   :  { %247 = vmatprep.subr.mxu0 %v42_v11  ;;  %275 = vmatprep.subr.mxu1 %v42_v11 }
  0x25   :  { %248 = vmatpush3.msra.mxu0 %v42_v11  ;;  %291 = vmatpush3.msra.mxu1 %v42_v11 }
  0x26   :  { %249 = vmatprep.subr.mxu0 %v41_v12  ;;  %276 = vmatprep.subr.mxu1 %v41_v12 }
  0x27   :  { %250 = vmatpush3.msra.mxu0 %v41_v12  ;;  %292 = vmatpush3.msra.mxu1 %v41_v12 }
  0x28   :  { %251 = vmatprep.subr.mxu0 %v40_v13  ;;  %277 = vmatprep.subr.mxu1 %v40_v13 }
  0x29   :  { %252 = vmatpush3.msra.mxu0 %v40_v13  ;;  %293 = vmatpush3.msra.mxu1 %v40_v13 }
  0x2a   :  { %253 = vmatprep.subr.mxu0 %v39_v14  ;;  %278 = vmatprep.subr.mxu1 %v39_v14 }
  0x2b   :  { %254 = vmatpush3.msra.mxu0 %v39_v14  ;;  %294 = vmatpush3.msra.mxu1 %v39_v14 }
  0x2c   :  { %255 = vmatprep.subr.mxu0 %v38_v15  ;;  %279 = vmatprep.subr.mxu1 %v38_v15 }
  0x2d   :  { %256 = vmatpush3.msra.mxu0 %v38_v15  ;;  %295 = vmatpush3.msra.mxu1 %v38_v15 }
  0x2e   :  { %257 = vmatprep.subr.mxu0 %v37_v16  ;;  %280 = vmatprep.subr.mxu1 %v37_v16 }
  0x2f   :  { %258 = vmatpush3.msra.mxu0 %v37_v16  ;;  %296 = vmatpush3.msra.mxu1 %v37_v16 }
  0x30   :  { %259 = vmatprep.mubr.f32.mxu0 %v33_v17  ;;  %262 = vmatprep.mubr.f32.mxu1 %v35_v18 }
  0x31   :  { %260 = vmatmul.mubr.f32.vlgmr.msra.gmra.mxu0 %v34_v19  ;;  %263 = vmatmul.mubr.f32.vlgmr.msra.gmra.mxu1 %v36_v20 }
  0x32   :  { %148 = vperm.xlu0 %302, %v142_v21   ;;  %158 = vperm.xlu1 %303, %v144_v22  }
  0x36   :  { %153 = vperm.xlu0 %302, %v143_v23   ;;  %163 = vperm.xlu1 %303, %v145_v24  }
  0xad   :  { %v149_v25 = vpop.permute.xlu0 %148  ;;  %v159_v26 = vpop.permute.xlu1 %158 }
  0xb1   :  { %v154_v34 = vpop.permute.xlu0 %153  ;;  %v164_v38 = vpop.permute.xlu1 %163 }
  0xf1   :  { %v261_v27 = vpop.f32.mrf.mxu0  ;;  %v264_v28 = vpop.f32.mrf.mxu1 }
  0xf2   :  { %v139_v29 = vmax.f32 %v261_v27, 0.0  ;;  %v141_v36 = vmax.f32 %v264_v28, 0.0 }
  0xf3   :  { %v119_v30 = vpop.f32.mrf.mxu0  ;;  %v129_v31 = vpop.f32.mrf.mxu1 }
  0xf4   :  { %v138_v32 = vmax.f32 %v119_v30, 0.0  ;;  %v140_v33 = vmax.f32 %v129_v31, 0.0  ;;  %v167_v35 = vmul.f32 %v154_v34, %v139_v29  ;;  %v169_v42 = vmul.f32 %v164_v38, %v141_v36 }
  0xf6   :  { %v166_v37 = vmul.f32 %v149_v25, %v138_v32  ;;  %v168_v40 = vmul.f32 %v159_v26, %v140_v33 }
  0xf8   :  { %v170_v39 = vadd.f32 %v167_v35, %v166_v37 }
  0xfa   :  { %v171_v41 = vadd.f32 %v170_v39, %v168_v40 }
  0xfc   :  { %v172_v43 = vadd.f32 %v171_v41, %v169_v42 }
  0xfe   :  { %v173_v44 = vrot.slane %v172_v43, 4 }
 0x100   :  { %v174_v45 = vadd.f32 %v173_v44, %v172_v43 }
 0x102   :  { %v175_v46 = vrot.slane %v174_v45, 2 }
 0x104   :  { %v176_v47 = vadd.f32 %v175_v46, %v174_v45 }
 0x106   :  { %v177_v48 = vrot.slane %v176_v47, 1 }
 0x108   :  { %v178_v50 = vadd.f32 %v177_v48, %v176_v47 }
 0x10a   :  { %v181_v51 = vadd.f32 %v180_v49, %v178_v50 }
 0x10c   :  { %v206_v52 = vmul.f32 -1.442695, %v181_v51 }
 0x10e   :  { %304 = vpow2.f32 %v206_v52 }
 0x11b   :  { %v305_v53 = vpop.eup %304 }
 0x11c   :  { %v185_v54 = vadd.f32 1.0, %v305_v53 }
 0x11e   :  { %306 = vrcp.f32 %v185_v54 }
 0x12b   :  { %v307_v55 = vpop.eup %306 }
 0x12c   :  { %v188_v56 = vmul.f32 4.0, %v307_v55 }
 0x12e   :  { %v189_v57 = vadd.f32 1.0, %v188_v56 }
 0x130   :  { %190 = vst [vmem:[#allocation6] sm:$0x1] %v189_v57 }
 0x131   :  { %339 = shalt.err (!%p336_p9)
}
 0x132   :  { %200 = dma.vmem_to_hbm [thread:$0]  %s198_s12, 16, %s419_s4, [#allocation5]  }
 0x133   :  { %350 = dma.done.wait [#allocation5], 16  }
 0x134   :  { %351 = vsyncadd [#allocation5], 4294967280 }
 0x135   :  { %204 = vsyncpa [#allocation4], 1 }
 0x136   :  { %205 = vsyncpa [#allocation5], 1 }

</bundles_post_ra>
